<compile_context>
chip_gen: v6e
topology: v6e:2x2x1
jax: 0.10.0
libtpu: 0.0.40
codegen_flags: <defaults>
</compile_context>

<pallas_src>
import jax
import jax.numpy as jnp
from jax.experimental import pallas as pl
from jax.experimental.pallas import tpu as pltpu


def _linear_kernel(w_ref, b_ref, x_ref, o_ref):
    # w_ref: SMEM (3,) f32, b_ref: SMEM (1,) f32
    # x_ref: VMEM (3, TN) feature-major tile, o_ref: VMEM (1, TN) lane-dense.
    w0 = w_ref[0]
    w1 = w_ref[1]
    w2 = w_ref[2]
    b = b_ref[0]
    x = x_ref[...]                                   # (3, TN) f32
    # Pure VPU FMA chain; scalar weights broadcast for free.
    o_ref[...] = x[0:1, :] * w0 + x[1:2, :] * w1 + x[2:3, :] * w2 + b


def polynomial_regression_forward(x, weight, bias, *, tile_n=512):
    """Equivalent of PolynomialRegression.forward (nn.Linear(3, 1)).

    x      : (N, 3) float32
    weight : (1, 3) float32  (torch nn.Linear weight layout)
    bias   : (1,)   float32
    returns: (N, 1) float32
    """
    N, K = x.shape
    assert K == 3, "PolynomialRegression expects 3 input features"

    x = x.astype(jnp.float32)
    w = weight.reshape(3).astype(jnp.float32)
    b = bias.reshape(1).astype(jnp.float32)

    # Lane-aligned tile over N; pad N so every block is full-width.
    # NOTE: for tiny N (like the demo) Pallas call overhead dominates the ~N*7
    # FLOPs of work; this kernel only pays off for N in the tens of thousands.
    tn = tile_n if N >= tile_n else ((N + 127) // 128) * 128
    n_pad = pl.cdiv(N, tn) * tn

    # Feature-major, zero-padded: (3, N_pad). One transpose in the wrapper.
    xt = jnp.pad(x.T, ((0, 0), (0, n_pad - N)))

    out = pl.pallas_call(
        _linear_kernel,
        out_shape=jax.ShapeDtypeStruct((1, n_pad), jnp.float32),
        grid_spec=pltpu.PrefetchScalarGridSpec(
            num_scalar_prefetch=0,
            grid=(n_pad // tn,),
            in_specs=[
                pl.BlockSpec(memory_space=pltpu.MemorySpace.SMEM),  # w (3,)
                pl.BlockSpec(memory_space=pltpu.MemorySpace.SMEM),  # b (1,)
                pl.BlockSpec((3, tn), lambda i: (0, i)),            # x tile
            ],
            out_specs=pl.BlockSpec((1, tn), lambda i: (0, i)),
        ),
        compiler_params=pltpu.CompilerParams(
            dimension_semantics=("parallel",),  # shard N tiles across TCs (v7x)
        ),
    )(w, b, xt)

    # Back to PyTorch's (N, 1) output layout.
    return out[:, :N].T


if __name__ == "__main__":
    key = jax.random.PRNGKey(0)
    kx, kw, kb = jax.random.split(key, 3)

    # nn.Linear(3, 1) parameters: W (1, 3), b (1,)
    W = jax.random.uniform(kw, (1, 3), dtype=jnp.float32, minval=-0.5, maxval=0.5)
    b = jax.random.uniform(kb, (1,), dtype=jnp.float32, minval=-0.5, maxval=0.5)

    # Small batch of 8 samples with 3 polynomial features each.
    x = jax.random.normal(kx, (8, 3), dtype=jnp.float32)

    out = polynomial_regression_forward(x, W, b)
    out = jax.block_until_ready(out)

    # Pure-JAX reference check.
    ref = x @ W.T + b
    assert out.shape == (8, 1), f"bad output shape {out.shape}"
    assert jnp.allclose(out, ref, atol=1e-5), "mismatch vs reference"

    print("KERNEL_OK")
</pallas_src>

<mosaic_0001>
module attributes {stable_mosaic.version = 11 : i64} {
  func.func @_linear_kernel(%arg0: i32, %arg1: memref<3xf32, #tpu.memory_space<smem>>, %arg2: memref<1xf32, #tpu.memory_space<smem>>, %arg3: memref<3x128xf32, #tpu.memory_space<vmem>>, %arg4: memref<1x128xf32, #tpu.memory_space<vmem>>) attributes {dimension_semantics = [#tpu.dimension_semantics<parallel>], iteration_bounds = array<i64: 1>, scalar_prefetch = 0 : i64, scratch_operands = 0 : i64, tpu.core_type = #tpu.core_type<tc>, window_params = [{transform_indices = @transform_0, window_bounds = array<i64: 3>}, {transform_indices = @transform_1, window_bounds = array<i64: 1>}, {transform_indices = @transform_2, window_bounds = array<i64: 3, 128>}, {transform_indices = @transform_3, window_bounds = array<i64: 1, 128>}]} {
    %c0 = arith.constant 0 : index
    %0 = memref.load %arg1[%c0] : memref<3xf32, #tpu.memory_space<smem>>
    %c1 = arith.constant 1 : index
    %1 = memref.load %arg1[%c1] : memref<3xf32, #tpu.memory_space<smem>>
    %c2 = arith.constant 2 : index
    %2 = memref.load %arg1[%c2] : memref<3xf32, #tpu.memory_space<smem>>
    %c0_0 = arith.constant 0 : index
    %3 = memref.load %arg2[%c0_0] : memref<1xf32, #tpu.memory_space<smem>>
    %c0_1 = arith.constant 0 : index
    %c0_2 = arith.constant 0 : index
    %4 = vector.load %arg3[%c0_1, %c0_2] : memref<3x128xf32, #tpu.memory_space<vmem>>, vector<3x128xf32>
    %5 = vector.extract_strided_slice %4 {offsets = [0, 0], sizes = [1, 128], strides = [1, 1]} : vector<3x128xf32> to vector<1x128xf32>
    %6 = vector.broadcast %0 : f32 to vector<1x128xf32>
    %7 = arith.mulf %5, %6 : vector<1x128xf32>
    %8 = vector.extract_strided_slice %4 {offsets = [1, 0], sizes = [1, 128], strides = [1, 1]} : vector<3x128xf32> to vector<1x128xf32>
    %9 = vector.broadcast %1 : f32 to vector<1x128xf32>
    %10 = arith.mulf %8, %9 : vector<1x128xf32>
    %11 = arith.addf %7, %10 : vector<1x128xf32>
    %12 = vector.extract_strided_slice %4 {offsets = [2, 0], sizes = [1, 128], strides = [1, 1]} : vector<3x128xf32> to vector<1x128xf32>
    %13 = vector.broadcast %2 : f32 to vector<1x128xf32>
    %14 = arith.mulf %12, %13 : vector<1x128xf32>
    %15 = arith.addf %11, %14 : vector<1x128xf32>
    %16 = vector.broadcast %3 : f32 to vector<1x128xf32>
    %17 = arith.addf %15, %16 : vector<1x128xf32>
    %c0_3 = arith.constant 0 : index
    %c0_4 = arith.constant 0 : index
    %18 = vector.load %arg4[%c0_3, %c0_4] : memref<1x128xf32, #tpu.memory_space<vmem>>, vector<1x128xf32>
    tpu.vector_store %arg4[%c0_3, %c0_4], %17 {strides = array<i32>} : memref<1x128xf32, #tpu.memory_space<vmem>>, vector<1x128xf32>,
    return
  }
  func.func @transform_0(%arg0: i32) -> i32 {
    %c0_i32 = arith.constant 0 : i32
    %c0_i32_0 = arith.constant 0 : i32
    return %c0_i32 : i32
  }
  func.func @transform_1(%arg0: i32) -> i32 {
    %c0_i32 = arith.constant 0 : i32
    %c0_i32_0 = arith.constant 0 : i32
    return %c0_i32 : i32
  }
  func.func @transform_2(%arg0: i32) -> (i32, i32) {
    %c0_i32 = arith.constant 0 : i32
    %c0_i32_0 = arith.constant 0 : i32
    return %c0_i32, %arg0 : i32, i32
  }
  func.func @transform_3(%arg0: i32) -> (i32, i32) {
    %c0_i32 = arith.constant 0 : i32
    %c0_i32_0 = arith.constant 0 : i32
    return %c0_i32, %arg0 : i32, i32
  }
}

</mosaic_0001>

<bundles_post_ra>
// kernel: tpu_custom_call.1
= control target key start
LH: loop header
LB: loop body
LE: loop exit
PB: predicated region body
PF: predicated region fallthrough
CT: control target
= control target key end

     0   :  { %9 = vsyncpa [#allocation6], 0  ;;  %s177_s0 = inlined_call_operand.vmem [shape: f32[3], index: 0, kind: input, shape index: {}]   ;;  %s178_s1 = inlined_call_operand.<no memory space> [shape: f32[1], index: 1, kind: input, shape index: {}]   ;;  %s179_s2 = inlined_call_operand.hbm [shape: f32[3,128], index: 2, kind: input, shape index: {}]   ;;  %s180_s3 = inlined_call_operand.hbm [shape: f32[1,128], index: 3, kind: output, shape index: {}]  }
   0x1   :  { %10 = vsyncpa [#allocation4], 0 }
   0x2   :  { %11 = vsyncpa [#allocation5], 0  ;;  %s18_s14 = sshll.u32 %s177_s0, 4  ;;  %s19_s14 = int_to_ptr.vmem [resolvable:$true] %s18_s14 }
   0x3   :  { %s84_s15 = scalar_lea.vmem %s19_s14, 16  ;;  %p89_p1 = scmp.lt.s32.totalorder %s19_s14, %s19_s14 }
   0x4   :  { %p85_p0 = scmp.ne.s32.totalorder %s19_s14, %s84_s15  ;;  %p90_p2 = scmp.lt.s32.totalorder %s84_s15, %s84_s15 }
   0x6   :  { %p91_p3 = por %p90_p2, %p89_p1 }
   0x8   :  { %p92_p4 = pnand %p91_p3, %p85_p0 }
   0xa   :  { %95 = shalt.err (!%p92_p4)
}
   0xb   :  { %s142_s16 = smov [#allocation3]   ;;  %s143_s17 = smov [#allocation7]  }
   0xc   :  { %21 = dma.vmem_to_smem %s19_s14, 16, %s142_s16, [#allocation6]  }
   0xd   :  { %s30_s18 = sshll.u32 %s143_s17, 4  ;;  %s31_s18 = int_to_ptr.vmem [resolvable:$true] %s30_s18 }
   0xe   :  { %s104_s19 = scalar_lea.vmem %s31_s18, 64  ;;  %p109_p6 = scmp.lt.s32.totalorder %s31_s18, %s31_s18 }
   0xf   :  { %p105_p5 = scmp.ne.s32.totalorder %s31_s18, %s104_s19  ;;  %p110_p7 = scmp.lt.s32.totalorder %s104_s19, %s104_s19 }
  0x11   :  { %p111_p8 = por %p110_p7, %p109_p6 }
  0x13   :  { %p112_p9 = pnand %p111_p8, %p105_p5 }
  0x15   :  { %115 = shalt.err (!%p112_p9)
}
  0x16   :  { %33 = dma.hbm_to_vmem [thread:$0]  %s179_s2, 64, %s31_s18, [#allocation4]  }
  0x17   :  { %136 = dma.done.wait [#allocation6], 16  }
  0x18   :  { %137 = vsyncadd [#allocation6], 4294967280 }
  0x19   :  { %138 = dma.done.wait [#allocation4], 64  }
  0x1a   :  { %139 = vsyncadd [#allocation4], 4294967232 }
  0x1b   :  { %40 = sfence }
  0x1c   :  { %s41_s21 = sld [smem:[#allocation3]]  ;;  %v45_v0 = vld [vmem:[#allocation7] sm:$0x7]  ;;  %v60_v10 = vstv %s178_s1  ;;  %s144_s25 = smov [#allocation8]  }
  0x1d   :  { %s79_s22 = sld [smem:[#allocation3 + $0x1]]  ;;  %s69_s26 = sshll.u32 %s144_s25, 4  ;;  %s70_s26 = int_to_ptr.vmem [resolvable:$true] %s69_s26 }
  0x1e   :  { %s80_s23 = sld [smem:[#allocation3 + $0x2]]  ;;  %s116_s27 = scalar_lea.vmem %s70_s26, 16 }
  0x1f   :  { %p117_p10 = scmp.ne.s32.totalorder %s70_s26, %s116_s27  ;;  %s120_s28 = scalar_lea.vmem %s70_s26, 32 }
  0x20   :  { %p121_p11 = scmp.lt.s32.totalorder %s70_s26, %s70_s26  ;;  %p122_p12 = scmp.lt.s32.totalorder %s120_s28, %s116_s27 }
  0x22   :  { %v46_v1 = vstv %s41_s21  ;;  %p123_p13 = por %p122_p12, %p121_p11 }
  0x23   :  { %v48_v2 = vstv %s79_s22  ;;  %v47_v3 = vmul.f32 %v46_v1, %v45_v0 }
  0x24   :  { %v49_v4 = vmul.f32 %v48_v2, %v45_v0  ;;  %v54_v5 = vstv %s80_s23  ;;  %p124_p0 = pnand %p123_p13, %p117_p10 }
  0x25   :  { %v55_v6 = vmul.f32 %v54_v5, %v45_v0 }
  0x26   :  { %v51_v7 = vrot.slane %v49_v4, 1 }
  0x27   :  { %v57_v8 = vrot.slane %v55_v6, 2 }
  0x28   :  { %v53_v9 = vadd.f32 %v51_v7, %v47_v3 }
  0x2a   :  { %v59_v11 = vadd.f32 %v57_v8, %v53_v9 }
  0x2c   :  { %v61_v12 = vadd.f32 %v60_v10, %v59_v11 }
  0x2e   :  { %62 = vst [vmem:[#allocation8] sm:$0x1] %v61_v12 }
  0x2f   :  { %127 = shalt.err (!%p124_p0)
}
  0x30   :  { %72 = dma.vmem_to_hbm [thread:$0]  %s70_s26, 16, %s180_s3, [#allocation5]  }
  0x31   :  { %140 = dma.done.wait [#allocation5], 16  }
  0x32   :  { %141 = vsyncadd [#allocation5], 4294967280 }
  0x33   :  { %76 = vsyncpa [#allocation4], 1 }
  0x34   :  { %77 = vsyncpa [#allocation5], 1 }
  0x35   :  { %78 = vsyncpa [#allocation6], 1 }

</bundles_post_ra>
